<compile_context>
chip_gen: v5e
topology: v5e:2x2
jax: 0.10.0
libtpu: 0.0.40
codegen_flags: <defaults>
</compile_context>

<pallas_src>
import math

import jax
import jax.numpy as jnp
from jax.experimental import pallas as pl
from jax.experimental.pallas import tpu as pltpu


def _round_up(x, m):
    return (x + m - 1) // m * m


# ----------------------------------------------------------------------------
# Host-side weight packing
# ----------------------------------------------------------------------------
def pack_hodlr_weights(weight_us, weight_vs, weight_ds, d_in, d_out):
    """Packs the HODLR factors into three lane-dense 2-D matrices.

    Returns (u_all, v_all, d_bd) where
      u_all : (d_in, R_total)   block-diagonal per level, levels concatenated
      v_all : (R_total, d_out)  block-diagonal per level with the pair-swap
                                permutation baked into the column placement
      d_bd  : (d_in, d_out)     block-diagonal leaf weights
    so that   x @ u_all @ v_all + x @ d_bd   equals the HODLR forward
    (minus bias).  R_total may be 0 when num_layers == 0.
    """
    u_cols, v_rows = [], []
    for u, v in zip(weight_us, weight_vs):
        n, bi, r = u.shape
        bo = v.shape[2]
        u_bd = jnp.zeros((d_in, n * r), u.dtype)
        v_bd = jnp.zeros((n * r, d_out), v.dtype)
        for j in range(n):
            u_bd = u_bd.at[j * bi:(j + 1) * bi, j * r:(j + 1) * r].set(u[j])
            jp = j ^ 1  # pair-swap permutation (involution) baked in
            v_bd = v_bd.at[j * r:(j + 1) * r, jp * bo:(jp + 1) * bo].set(v[j])
        u_cols.append(u_bd)
        v_rows.append(v_bd)

    if u_cols:
        u_all = jnp.concatenate(u_cols, axis=1)
        v_all = jnp.concatenate(v_rows, axis=0)
    else:
        u_all, v_all = None, None

    n_leaf, bi, bo = weight_ds.shape
    d_bd = jnp.zeros((d_in, d_out), weight_ds.dtype)
    for j in range(n_leaf):
        d_bd = d_bd.at[j * bi:(j + 1) * bi, j * bo:(j + 1) * bo].set(weight_ds[j])
    return u_all, v_all, d_bd


# ----------------------------------------------------------------------------
# Pallas kernel
# ----------------------------------------------------------------------------
def make_hodlr_kernel(has_lowrank, out_dtype):
    if has_lowrank:
        def kernel(x_ref, u_ref, v_ref, d_ref, b_ref, o_ref):
            x = x_ref[...]                                          # (tb, d_in)
            # off-diagonal low-rank path: two lane-dense matmuls
            t = jnp.dot(x, u_ref[...],
                        preferred_element_type=jnp.float32)         # (tb, R)
            acc = jnp.dot(t.astype(v_ref.dtype), v_ref[...],
                          preferred_element_type=jnp.float32)       # (tb, d_out)
            # block-diagonal dense path
            acc = acc + jnp.dot(x, d_ref[...],
                                preferred_element_type=jnp.float32)
            # bias
            acc = acc + b_ref[...].astype(jnp.float32)
            o_ref[...] = acc.astype(out_dtype)
    else:
        # num_layers == 0: only the block-diagonal (here dense) part + bias.
        def kernel(x_ref, d_ref, b_ref, o_ref):
            x = x_ref[...]
            acc = jnp.dot(x, d_ref[...], preferred_element_type=jnp.float32)
            acc = acc + b_ref[...].astype(jnp.float32)
            o_ref[...] = acc.astype(out_dtype)
    return kernel


# ----------------------------------------------------------------------------
# Wrapper
# ----------------------------------------------------------------------------
def hodlr_linear(x, weight_us, weight_vs, weight_ds, bias, *, tb=256):
    """HODLRLinear forward.  x: (..., d_in) -> (..., d_out)."""
    *dims, d_in = x.shape
    d_out = weight_ds.shape[0] * weight_ds.shape[2]
    n_tok = math.prod(dims) if dims else 1

    # Token tile: big (MXU-row / sublane dense), but never larger than the
    # 8-aligned token count.  Pad the token axis to a multiple of tb.
    tb = max(8, min(tb, _round_up(n_tok, 8)))
    n_pad = _round_up(n_tok, tb)

    x2 = x.reshape(n_tok, d_in)
    if n_pad != n_tok:
        x2 = jnp.pad(x2, ((0, n_pad - n_tok), (0, 0)))
    bias2 = bias.reshape(1, d_out)

    u_all, v_all, d_bd = pack_hodlr_weights(
        weight_us, weight_vs, weight_ds, d_in, d_out)
    has_lowrank = u_all is not None

    kernel = make_hodlr_kernel(has_lowrank, x.dtype)

    in_specs = [pl.BlockSpec((tb, d_in), lambda b: (b, 0))]
    operands = [x2]
    if has_lowrank:
        in_specs += [pl.BlockSpec(u_all.shape, lambda b: (0, 0)),
                     pl.BlockSpec(v_all.shape, lambda b: (0, 0))]
        operands += [u_all, v_all]
    in_specs += [pl.BlockSpec(d_bd.shape, lambda b: (0, 0)),
                 pl.BlockSpec((1, d_out), lambda b: (0, 0))]
    operands += [d_bd, bias2]

    # Note: for d_in/d_out of a few hundred and tb<=1024 the double-buffered
    # tiles + resident packed weights are well under the default 32 MiB scoped
    # VMEM limit on all generations, so vmem_limit_bytes is left at default.
    out = pl.pallas_call(
        kernel,
        out_shape=jax.ShapeDtypeStruct((n_pad, d_out), x.dtype),
        grid_spec=pltpu.PrefetchScalarGridSpec(
            num_scalar_prefetch=0,
            grid=(n_pad // tb,),
            in_specs=in_specs,
            out_specs=pl.BlockSpec((tb, d_out), lambda b: (b, 0)),
        ),
        compiler_params=pltpu.CompilerParams(
            dimension_semantics=("parallel",)),
    )(*operands)

    if n_pad != n_tok:
        out = out[:n_tok]
    return out.reshape(*dims, d_out)


# ----------------------------------------------------------------------------
# Pure-JAX reference (mirrors the PyTorch forward exactly)
# ----------------------------------------------------------------------------
def hodlr_ref(x, weight_us, weight_vs, weight_ds, bias):
    *dims, d_in = x.shape
    num_layers = len(weight_us)
    d_out = bias.shape[0]
    out = jnp.zeros((*dims, d_out), x.dtype)
    for i in range(num_layers):
        n = 2 ** (i + 1)
        perm = jnp.arange(d_out).reshape(2 ** i, 2, -1)[:, ::-1, :].reshape(-1)
        temp = jnp.einsum('...ni,nij,njk->...nk',
                          x.reshape(*dims, n, -1), weight_us[i], weight_vs[i]
                          ).reshape(*dims, d_out)
        out = out.at[..., perm].add(temp)
    n_leaf = 2 ** num_layers
    out = out + jnp.einsum('...ni,nij->...nj',
                           x.reshape(*dims, n_leaf, -1), weight_ds
                           ).reshape(*dims, d_out)
    out = out + bias
    return out


# ----------------------------------------------------------------------------
# Main
# ----------------------------------------------------------------------------
if __name__ == "__main__":
    # Module configuration (consistent with HODLRLinear.__init__):
    in_features = 128
    out_features = 128
    min_block_size = 32
    rank = 8
    num_layers = max(int(math.log2(min(in_features, out_features) / min_block_size)), 0)  # = 2

    key = jax.random.PRNGKey(0)
    keys = jax.random.split(key, 2 * num_layers + 3)

    # Deterministic synthetic parameters (kaiming-uniform-style bounds).
    # NOTE: torch's init_weights zeroes weight_vs/bias; we use non-zero random
    # values so the full forward path is actually exercised.
    weight_us, weight_vs = [], []
    for i in range(1, num_layers + 1):
        n = 2 ** i
        r = min(rank, min(in_features, out_features) // n)
        bu = 1.0 / math.sqrt(in_features // n)
        bv = 1.0 / math.sqrt(r)
        weight_us.append(jax.random.uniform(
            keys[2 * (i - 1)], (n, in_features // n, r),
            minval=-bu, maxval=bu, dtype=jnp.float32))
        weight_vs.append(jax.random.uniform(
            keys[2 * (i - 1) + 1], (n, r, out_features // n),
            minval=-bv, maxval=bv, dtype=jnp.float32))

    n_leaf = 2 ** num_layers
    bd = 1.0 / math.sqrt(in_features // n_leaf)
    weight_ds = jax.random.uniform(
        keys[2 * num_layers], (n_leaf, in_features // n_leaf, out_features // n_leaf),
        minval=-bd, maxval=bd, dtype=jnp.float32)
    bias = jax.random.uniform(
        keys[2 * num_layers + 1], (out_features,),
        minval=-0.1, maxval=0.1, dtype=jnp.float32)

    # Example input: (b, seq, d_in) with a token count that is NOT a multiple
    # of the tile, exercising both the 2-step parallel grid and the padding.
    x = jax.random.normal(keys[2 * num_layers + 2], (2, 250, in_features), jnp.float32)

    out = hodlr_linear(x, weight_us, weight_vs, weight_ds, bias, tb=256)
    out = jax.block_until_ready(out)

    ref = hodlr_ref(x, weight_us, weight_vs, weight_ds, bias)
    assert out.shape == (2, 250, out_features)
    # Kernel accumulates in f32; accumulation grouping differs slightly from
    # the reference einsum, so use a modest (still bug-catching) tolerance.
    assert jnp.allclose(out, ref, rtol=1e-4, atol=1e-4), "mismatch vs reference"

    print("KERNEL_OK")
</pallas_src>

<mosaic_0001>
module attributes {stable_mosaic.version = 11 : i64} {
  func.func @kernel(%arg0: i32, %arg1: memref<256x128xf32, #tpu.memory_space<vmem>>, %arg2: memref<128x48xf32, #tpu.memory_space<vmem>>, %arg3: memref<48x128xf32, #tpu.memory_space<vmem>>, %arg4: memref<128x128xf32, #tpu.memory_space<vmem>>, %arg5: memref<1x128xf32, #tpu.memory_space<vmem>>, %arg6: memref<256x128xf32, #tpu.memory_space<vmem>>) attributes {dimension_semantics = [#tpu.dimension_semantics<parallel>], iteration_bounds = array<i64: 2>, scalar_prefetch = 0 : i64, scratch_operands = 0 : i64, tpu.core_type = #tpu.core_type<tc>, window_params = [{transform_indices = @transform_0, window_bounds = array<i64: 256, 128>}, {pipeline_mode = #tpu.pipeline_mode<synchronous>, transform_indices = @transform_1, window_bounds = array<i64: 128, 48>}, {pipeline_mode = #tpu.pipeline_mode<synchronous>, transform_indices = @transform_2, window_bounds = array<i64: 48, 128>}, {pipeline_mode = #tpu.pipeline_mode<synchronous>, transform_indices = @transform_3, window_bounds = array<i64: 128, 128>}, {pipeline_mode = #tpu.pipeline_mode<synchronous>, transform_indices = @transform_4, window_bounds = array<i64: 1, 128>}, {transform_indices = @transform_5, window_bounds = array<i64: 256, 128>}]} {
    %c0 = arith.constant 0 : index
    %c0_0 = arith.constant 0 : index
    %0 = vector.load %arg1[%c0, %c0_0] : memref<256x128xf32, #tpu.memory_space<vmem>>, vector<256x128xf32>
    %c0_1 = arith.constant 0 : index
    %c0_2 = arith.constant 0 : index
    %1 = vector.load %arg2[%c0_1, %c0_2] : memref<128x48xf32, #tpu.memory_space<vmem>>, vector<128x48xf32>
    %cst = arith.constant dense<0.000000e+00> : vector<256x48xf32>
    %2 = tpu.matmul %0, %1, %cst {dimension_numbers = #tpu.dot_dimension_numbers<[1], [0], [0], [1], [0, 0, 1, 1], [], []>} : vector<256x128xf32>, vector<128x48xf32>, vector<256x48xf32> -> vector<256x48xf32>
    %c0_3 = arith.constant 0 : index
    %c0_4 = arith.constant 0 : index
    %3 = vector.load %arg3[%c0_3, %c0_4] : memref<48x128xf32, #tpu.memory_space<vmem>>, vector<48x128xf32>
    %cst_5 = arith.constant dense<0.000000e+00> : vector<256x128xf32>
    %4 = tpu.matmul %2, %3, %cst_5 {dimension_numbers = #tpu.dot_dimension_numbers<[1], [0], [0], [1], [0, 0, 1, 1], [], []>} : vector<256x48xf32>, vector<48x128xf32>, vector<256x128xf32> -> vector<256x128xf32>
    %c0_6 = arith.constant 0 : index
    %c0_7 = arith.constant 0 : index
    %5 = vector.load %arg4[%c0_6, %c0_7] : memref<128x128xf32, #tpu.memory_space<vmem>>, vector<128x128xf32>
    %cst_8 = arith.constant dense<0.000000e+00> : vector<256x128xf32>
    %6 = tpu.matmul %0, %5, %cst_8 {dimension_numbers = #tpu.dot_dimension_numbers<[1], [0], [0], [1], [0, 0, 1, 1], [], []>} : vector<256x128xf32>, vector<128x128xf32>, vector<256x128xf32> -> vector<256x128xf32>
    %7 = arith.addf %4, %6 : vector<256x128xf32>
    %c0_9 = arith.constant 0 : index
    %c0_10 = arith.constant 0 : index
    %8 = vector.load %arg5[%c0_9, %c0_10] : memref<1x128xf32, #tpu.memory_space<vmem>>, vector<1x128xf32>
    %9 = vector.broadcast %8 : vector<1x128xf32> to vector<256x128xf32>
    %10 = arith.addf %7, %9 : vector<256x128xf32>
    %c0_11 = arith.constant 0 : index
    %c0_12 = arith.constant 0 : index
    %11 = vector.load %arg6[%c0_11, %c0_12] : memref<256x128xf32, #tpu.memory_space<vmem>>, vector<256x128xf32>
    tpu.vector_store %arg6[%c0_11, %c0_12], %10 {strides = array<i32>} : memref<256x128xf32, #tpu.memory_space<vmem>>, vector<256x128xf32>,
    return
  }
  func.func @transform_0(%arg0: i32) -> (i32, i32) {
    %c0_i32 = arith.constant 0 : i32
    %c0_i32_0 = arith.constant 0 : i32
    return %arg0, %c0_i32 : i32, i32
  }
  func.func @transform_1(%arg0: i32) -> (i32, i32) {
    %c0_i32 = arith.constant 0 : i32
    %c0_i32_0 = arith.constant 0 : i32
    %c0_i32_1 = arith.constant 0 : i32
    return %c0_i32, %c0_i32_0 : i32, i32
  }
  func.func @transform_2(%arg0: i32) -> (i32, i32) {
    %c0_i32 = arith.constant 0 : i32
    %c0_i32_0 = arith.constant 0 : i32
    %c0_i32_1 = arith.constant 0 : i32
    return %c0_i32, %c0_i32_0 : i32, i32
  }
  func.func @transform_3(%arg0: i32) -> (i32, i32) {
    %c0_i32 = arith.constant 0 : i32
    %c0_i32_0 = arith.constant 0 : i32
    %c0_i32_1 = arith.constant 0 : i32
    return %c0_i32, %c0_i32_0 : i32, i32
  }
  func.func @transform_4(%arg0: i32) -> (i32, i32) {
    %c0_i32 = arith.constant 0 : i32
    %c0_i32_0 = arith.constant 0 : i32
    %c0_i32_1 = arith.constant 0 : i32
    return %c0_i32, %c0_i32_0 : i32, i32
  }
  func.func @transform_5(%arg0: i32) -> (i32, i32) {
    %c0_i32 = arith.constant 0 : i32
    %c0_i32_0 = arith.constant 0 : i32
    return %arg0, %c0_i32 : i32, i32
  }
}

</mosaic_0001>

<bundles_post_ra>
// kernel: tpu_custom_call.1
= control target key start
LH: loop header
LB: loop body
LE: loop exit
PB: predicated region body
PF: predicated region fallthrough
CT: control target
= control target key end

     0   :  { %10 = vsyncpa [#allocation3], 0  ;;  %s1690_s0 = inlined_call_operand.hbm [shape: f32[512,128], index: 0, kind: input, shape index: {}]   ;;  %s1691_s1 = inlined_call_operand.vmem [shape: f32[128,48], index: 1, kind: input, shape index: {}]   ;;  %s1692_s2 = inlined_call_operand.vmem [shape: f32[48,128], index: 2, kind: input, shape index: {}]   ;;  %s1693_s3 = inlined_call_operand.vmem [shape: f32[128,128], index: 3, kind: input, shape index: {}]   ;;  %s1694_s4 = inlined_call_operand.vmem [shape: f32[1,128], index: 4, kind: input, shape index: {}]   ;;  %s1695_s5 = inlined_call_operand.hbm [shape: f32[512,128], index: 5, kind: output, shape index: {}]  }
   0x1   :  { %12 = vsyncpa [#allocation3 + $0x1], 0 }
   0x2   :  { %13 = vsyncpa [#allocation4], 0 }
   0x3   :  { %15 = vsyncpa [#allocation4 + $0x1], 0  ;;  %s1179_s18 = smov 0   ;;  %s1181_s19 = smov 0  }
   0x4   :  { %s1183_s20 = smov 0   ;;  %s1185_s21 = smov 0  }
   0x5 LB: > { %s1200_s22 = sadd.s32 4294967295, %s1143_s21   ;;  %s910_s23 = sadd.s32 4294967294, %s1143_s21   ;;  %s1143_s21 = sphi %s1185_s21, %s1705_s21   ;;  %s1139_s20 = sphi %s1183_s20, %s1704_s20   ;;  %s1135_s19 = sphi %s1181_s19, %s1703_s19   ;;  %s1131_s18 = sphi %s1179_s18, %s1702_s18  }
   0x6   : > { %s1204_s24 = sadd.s32 1, %s1143_s21   ;;  %s28_s25 = sadd.s32 1, %s1139_s20 }
   0x7   : > { %s25_s26 = ssub.s32 %s1143_s21, %s1204_s24  ;;  %p35_p0 = scmp.ne.s32.totalorder %s1139_s20, %s1135_s19 }
   0x8   : > { %p26_p1 = scmp.eq.s32.totalorder %s25_s26, 0  ;;  %p36_p2 = scmp.eq.s32.totalorder %s1143_s21, 0 }
   0x9   : > { %p41_p3 = scmp.ne.s32.totalorder %s1135_s19, %s1131_s18  ;;  %p42_p4 = scmp.eq.s32.totalorder %s1200_s22, 0 }
   0xa   : > { %s1216_s27 = scalar_select %p26_p1, %s1139_s20, %s28_s25  }
   0xb   : > { %p1218_p5 = por %p36_p2, %p35_p0  ;;  %p1222_p6 = por %p42_p4, %p41_p3 }
   0xc   : > { %p149_p7 = scmp.eq.s32.totalorder %s1200_s22, 1  ;;  %p155_p8 = scmp.eq.s32.totalorder %s910_s23, 1 }
   0xd   : > { %p1008_p10 = scmp.lt.s32.totalorder %s1143_s21, 2  ;;  %s187_s7 = sand.u32 1, %s1139_s20  }
   0xe   : > { %p1229_p11 = por %p149_p7, %p35_p0  ;;  %p1233_p12 = por %p155_p8, %p41_p3 }
   0xf   : > { %s956_s8 = sshll.u32 %s1143_s21, 8  ;;  %s913_s9 = sshll.u32 %s187_s7, 8 }
  0x10   : > { %s196_s12 = scalar_lea.hbm %s1690_s0, %s956_s8  ;;  %s191_s14 = scalar_lea.vmem [#allocation2], %s913_s9 }
  0x11   : > { %s197_s13 = sshll.u32 %s196_s12, 4  ;;  %s199_s15 = sshll.u32 %s191_s14, 4  ;;  %s198_s13 = int_to_ptr.hbm [resolvable:$true] %s197_s13  ;;  %s200_s15 = int_to_ptr.vmem [resolvable:$true] %s199_s15 }
  0x12   : > { %p1244_p13 = pnand %p1008_p10, %p1218_p5  ;;  %p916_p0 = scmp.ge.s32.totalorder %s1143_s21, 1 }
  0x13   : > { %p207_p1 = scmp.lt.s32.totalorder %s1143_s21, 3  ;;  %s188_s17 = scalar_lea.sflag [#allocation3], %s187_s7 }
  0x14   : > { %s1047_s23 = sshra.s32 %s198_s13, 4  ;;  %p1051_p3 = pneg %p1244_p13  ;;  %s1048_s23 = int_to_ptr.hbm [resolvable:$true] %s1047_s23 }
  0x15   : > { %s1049_s25 = scalar_lea.hbm %s1048_s23, 256  ;;  %s1054_s28 = scalar_lea.hbm %s1690_s0, 512 }
  0x16   : > { %p1050_p2 = scmp.ne.s32.totalorder %s1048_s23, %s1049_s25  ;;  %p1055_p5 = scmp.lt.s32.totalorder %s1048_s23, %s1690_s0 }
  0x17   : > { %p1056_p8 = scmp.lt.s32.totalorder %s1054_s28, %s1049_s25 }
  0x18   : > { %p1052_p4 = pnand %p1051_p3, %p1050_p2 }
  0x19   : > { %p1057_p10 = por %p1056_p8, %p1055_p5 }
  0x1a   : > { %p1053_p7 = pneg %p1052_p4 }
  0x1c   : > { %p1058_p9 = pnand %p1057_p10, %p1053_p7 }
  0x1e   : > { %1061 = shalt.err (!%p1058_p9)
}
  0x1f   : > { %s1145_s7 = smov 128   ;;  %s1146_s11 = smov 8  }
  0x20   : > { %1003 = dma.hbm_to_vmem [thread:$0]  (!%p1244_p13), %s198_s13, 4096, %s200_s15, %s188_s17, %s1145_s7, %s1145_s7, %s1146_s11  }
  0x21   : > { %p208_p2 = pnand %p916_p0, %p207_p1 }
  0x22   : > { %s1265_s12 = sand.u32 (!%p208_p2), 1, %s1135_s19  }
  0x23   : > { %211 = sbr.rel (%p208_p2) target bundleno = 539 (0x21b), region = 40  ;;  %s917_s14 = sshll.u32 (!%p208_p2), %s1265_s12, 8 }
  0x24   : > { %s214_s23 = scalar_lea.sflag (!%p208_p2), [#allocation3], %s1265_s12  ;;  %s1271_s25 = scalar_lea.vmem (!%p208_p2), [#allocation2], %s917_s14 }
  0x28   : > { %1122 = dma.done.wait (%p1222_p6), %s214_s23, 4096  }
  0x29   : > { %1124 = vsyncadd (%p1222_p6), %s214_s23, 4294963200  ;;  %v294_v0 = vld [vmem:[%s1691_s1 + $0x78] sm:$0xff]  ;;  %v293_v1 = vld [vmem:[%s1691_s1 + $0x70] sm:$0xff]  ;;  %vm543_vm0 = vcmask 392192   ;;  %s1571_s23 = scalar_lea.vmem [#allocation5], %s917_s14  ;;  %s957_s14 = sshll.u32 %s1200_s22, 8 }
  0x2a   : > { %295 = vmatpush.msra.mxu0 %v294_v0  ;;  %958 = vmatpush.msra.mxu3 %v294_v0  ;;  %v292_v2 = vld [vmem:[%s1691_s1 + $0x68] sm:$0xff]  ;;  %v291_v3 = vld [vmem:[%s1691_s1 + $0x60] sm:$0xff]  ;;  %v290_v4 = vld [vmem:[%s1691_s1 + $0x58] sm:$0xff]  ;;  %s833_s16 = scalar_lea.hbm %s1695_s5, %s957_s14  ;;  %s834_s17 = sshll.u32 %s1571_s23, 4  ;;  %s835_s17 = int_to_ptr.vmem [resolvable:$true] %s834_s17 }
  0x2b   : > { %v289_v5 = vld [vmem:[%s1691_s1 + $0x50] sm:$0xff]  ;;  %v288_v6 = vld [vmem:[%s1691_s1 + $0x48] sm:$0xff]  ;;  %v287_v7 = vld [vmem:[%s1691_s1 + $0x40] sm:$0xff]  ;;  %s836_s26 = sshll.u32 %s833_s16, 4  ;;  %s822_s8 = scalar_lea.sflag [#allocation4], %s1265_s12  ;;  %s837_s26 = int_to_ptr.hbm [resolvable:$true] %s836_s26 }
  0x2c   : > { %296 = vmatpush.msra.mxu0 %v293_v1  ;;  %959 = vmatpush.msra.mxu3 %v293_v1  ;;  %v286_v8 = vld [vmem:[%s1691_s1 + $0x38] sm:$0xff]  ;;  %v285_v9 = vld [vmem:[%s1691_s1 + $0x30] sm:$0xff]  ;;  %v284_v10 = vld [vmem:[%s1691_s1 + $0x28] sm:$0xff]  ;;  %s1091_s22 = sshra.s32 %s837_s26, 4  ;;  %s1097_s10 = scalar_lea.hbm %s1695_s5, 512  ;;  %s1092_s22 = int_to_ptr.hbm [resolvable:$true] %s1091_s22 }
  0x2d   : > { %v283_v11 = vld [vmem:[%s1691_s1 + $0x20] sm:$0xff]  ;;  %v282_v12 = vld [vmem:[%s1691_s1 + $0x18] sm:$0xff]  ;;  %v281_v13 = vld [vmem:[%s1691_s1 + $0x10] sm:$0xff]  ;;  %s1093_s28 = scalar_lea.hbm %s1092_s22, 256  ;;  %p1098_p0 = scmp.lt.s32.totalorder %s1092_s22, %s1695_s5 }
  0x2e   : > { %297 = vmatpush.msra.mxu0 %v292_v2  ;;  %960 = vmatpush.msra.mxu3 %v292_v2  ;;  %v280_v14 = vld [vmem:[%s1691_s1 + $0x8] sm:$0xff]  ;;  %v279_v15 = vld [vmem:[%s1691_s1] sm:$0xff]  ;;  %v1334_v18 = vld [vmem:[%s1271_s25 + $0x10] sm:$0xff]  ;;  %p1094_p6 = scmp.ne.s32.totalorder %s1092_s22, %s1093_s28  ;;  %p1099_p1 = scmp.lt.s32.totalorder %s1097_s10, %s1093_s28 }
  0x2f   : > { %v1326_v16 = vld [vmem:[%s1271_s25] sm:$0xff]  ;;  %v1330_v17 = vld [vmem:[%s1271_s25 + $0x8] sm:$0xff]  ;;  %v1338_v19 = vld [vmem:[%s1271_s25 + $0x18] sm:$0xff] }
  0x30   : > { %298 = vmatpush.msra.mxu0 %v291_v3  ;;  %961 = vmatpush.msra.mxu3 %v291_v3  ;;  %v1342_v20 = vld [vmem:[%s1271_s25 + $0x20] sm:$0xff]  ;;  %v1346_v21 = vld [vmem:[%s1271_s25 + $0x28] sm:$0xff]  ;;  %v1350_v22 = vld [vmem:[%s1271_s25 + $0x30] sm:$0xff]  ;;  %p1095_p9 = pnand %p1094_p6, %p1229_p11  ;;  %p1100_p3 = por %p1099_p1, %p1098_p0 }
  0x31   : > { %v1354_v23 = vld [vmem:[%s1271_s25 + $0x38] sm:$0xff]  ;;  %v1358_v24 = vld [vmem:[%s1271_s25 + $0xc0] sm:$0xff]  ;;  %v1366_v26 = vld [vmem:[%s1271_s25 + $0xc8] sm:$0xff] }
  0x32   : > { %299 = vmatpush.msra.mxu0 %v290_v4  ;;  %962 = vmatpush.msra.mxu3 %v290_v4  ;;  %v1362_v25 = vld [vmem:[%s1271_s25 + $0x40] sm:$0xff]  ;;  %v429_v27 = vld [vmem:[%s1693_s3 + $0x78] sm:$0xff]  ;;  %v428_v28 = vld [vmem:[%s1693_s3 + $0x70] sm:$0xff]  ;;  %p1096_p13 = pneg %p1095_p9 }
  0x33   : > { %430 = vmatpush.msra.mxu1 %v429_v27  ;;  %v1376_v29 = vld [vmem:[%s1271_s25 + $0x48] sm:$0xff]  ;;  %v1383_v31 = vld [vmem:[%s1271_s25 + $0xd0] sm:$0xff]  ;;  %v426_v32 = vld [vmem:[%s1693_s3 + $0x60] sm:$0xff] }
  0x34   : > { %300 = vmatpush.msra.mxu0 %v289_v5  ;;  %963 = vmatpush.msra.mxu3 %v289_v5  ;;  %v427_v30 = vld [vmem:[%s1693_s3 + $0x68] sm:$0xff]  ;;  %v425_v33 = vld [vmem:[%s1693_s3 + $0x58] sm:$0xff]  ;;  %v424_v34 = vld [vmem:[%s1693_s3 + $0x50] sm:$0xff]  ;;  %p1101_p4 = pnand %p1100_p3, %p1096_p13 }
  0x35   : > { %431 = vmatpush.msra.mxu1 %v428_v28  ;;  %v1396_v35 = vld [vmem:[%s1271_s25 + $0x50] sm:$0xff]  ;;  %v423_v36 = vld [vmem:[%s1693_s3 + $0x48] sm:$0xff]  ;;  %v1403_v37 = vld [vmem:[%s1271_s25 + $0xd8] sm:$0xff] }
  0x36   : > { %301 = vmatpush.msra.mxu0 %v288_v6  ;;  %964 = vmatpush.msra.mxu3 %v288_v6  ;;  %v422_v38 = vld [vmem:[%s1693_s3 + $0x40] sm:$0xff]  ;;  %v413_v39 = vld [vmem:[%s1692_s2 + $0x28] sm:$0xff]  ;;  %v421_v41 = vld [vmem:[%s1693_s3 + $0x38] sm:$0xff] }
  0x37   : > { %432 = vmatpush.msra.mxu1 %v427_v30  ;;  %v412_v40 = vld [vmem:[%s1692_s2 + $0x20] sm:$0xff]  ;;  %650 = vmatpush.msra.mxu2 %v413_v39  ;;  %v411_v42 = vld [vmem:[%s1692_s2 + $0x18] sm:$0xff]  ;;  %v420_v43 = vld [vmem:[%s1693_s3 + $0x30] sm:$0xff] }
  0x38   : > { %302 = vmatpush.msra.mxu0 %v287_v7  ;;  %965 = vmatpush.msra.mxu3 %v287_v7  ;;  %v1425_v44 = vld [vmem:[%s1271_s25 + $0x58] sm:$0xff]  ;;  %v419_v45 = vld [vmem:[%s1693_s3 + $0x28] sm:$0xff]  ;;  %v410_v46 = vld [vmem:[%s1692_s2 + $0x10] sm:$0xff] }
  0x39   : > { %433 = vmatpush.msra.mxu1 %v426_v32  ;;  %651 = vmatpush.msra.mxu2 %v412_v40  ;;  %v1435_v47 = vld [vmem:[%s1271_s25 + $0xe0] sm:$0xff]  ;;  %v409_v49 = vld [vmem:[%s1692_s2 + $0x8] sm:$0xff]  ;;  %v417_v50 = vld [vmem:[%s1693_s3 + $0x18] sm:$0xff] }
  0x3a   : > { %303 = vmatpush.msra.mxu0 %v286_v8  ;;  %966 = vmatpush.msra.mxu3 %v286_v8  ;;  %v418_v48 = vld [vmem:[%s1693_s3 + $0x20] sm:$0xff]  ;;  %v416_v53 = vld [vmem:[%s1693_s3 + $0x10] sm:$0xff]  ;;  %v415_v54 = vld [vmem:[%s1693_s3 + $0x8] sm:$0xff] }
  0x3b   : > { %434 = vmatpush.msra.mxu1 %v425_v33  ;;  %652 = vmatpush.msra.mxu2 %v411_v42  ;;  %v408_v51 = vld [vmem:[%s1692_s2] sm:$0xff]  ;;  %v276_v55 = vld [vmem:[%s1271_s25 + $0xe8] sm:$0xff]  ;;  %v277_v58 = vld [vmem:[%s1271_s25 + $0xf0] sm:$0xff] }
  0x3c   : > { %304 = vmatpush.msra.mxu0 %v285_v9  ;;  %967 = vmatpush.msra.mxu3 %v285_v9  ;;  %v1451_v52 = vld [vmem:[%s1271_s25 + $0x60] sm:$0xff]  ;;  %v1466_v57 = vld [vmem:[%s1271_s25 + $0x68] sm:$0xff]  ;;  %v1472_v59 = vld [vmem:[%s1271_s25 + $0x70] sm:$0xff] }
  0x3d   : > { %435 = vmatpush.msra.mxu1 %v424_v34  ;;  %653 = vmatpush.msra.mxu2 %v410_v46  ;;  %v414_v56 = vld [vmem:[%s1693_s3] sm:$0xff]  ;;  %v278_v60 = vld [vmem:[%s1271_s25 + $0xf8] sm:$0xff]  ;;  %v1491_v1 = vld [vmem:[%s1271_s25 + $0x88] sm:$0xff] }
  0x3e   : > { %305 = vmatpush.msra.mxu0 %v284_v10  ;;  %968 = vmatpush.msra.mxu3 %v284_v10  ;;  %v1478_v61 = vld [vmem:[%s1271_s25 + $0x78] sm:$0xff]  ;;  %v1484_v63 = vld [vmem:[%s1271_s25 + $0x80] sm:$0xff]  ;;  %v1498_v3 = vld [vmem:[%s1271_s25 + $0x90] sm:$0xff] }
  0x3f   : > { %436 = vmatpush.msra.mxu1 %v423_v36  ;;  %654 = vmatpush.msra.mxu2 %v409_v49  ;;  %v1505_v5 = vld [vmem:[%s1271_s25 + $0x98] sm:$0xff]  ;;  %v1512_v7 = vld [vmem:[%s1271_s25 + $0xa0] sm:$0xff]  ;;  %v1518_v9 = vld [vmem:[%s1271_s25 + $0xa8] sm:$0xff] }
  0x40   : > { %306 = vmatpush.msra.mxu0 %v283_v11  ;;  %969 = vmatpush.msra.mxu3 %v283_v11  ;;  %v1524_v11 = vld [vmem:[%s1271_s25 + $0xb0] sm:$0xff] }
  0x41   : > { %437 = vmatpush.msra.mxu1 %v422_v38  ;;  %655 = vmatpush.msra.mxu2 %v408_v51 }
  0x42   : > { %307 = vmatpush.msra.mxu0 %v282_v12  ;;  %970 = vmatpush.msra.mxu3 %v282_v12 }
  0x43   : > { %438 = vmatpush.msra.mxu1 %v421_v41 }
  0x44   : > { %308 = vmatpush.msra.mxu0 %v281_v13  ;;  %971 = vmatpush.msra.mxu3 %v281_v13  ;;  %v1530_v13 = vld [vmem:[%s1271_s25 + $0xb8] sm:$0xff] }
  0x45   : > { %439 = vmatpush.msra.mxu1 %v420_v43 }
  0x46   : > { %309 = vmatpush.msra.mxu0 %v280_v14  ;;  %972 = vmatpush.msra.mxu3 %v280_v14 }
  0x47   : > { %440 = vmatpush.msra.mxu1 %v419_v45 }
  0x48   : > { %310 = vmatpush.msra.mxu0 %v279_v15  ;;  %973 = vmatpush.msra.mxu3 %v279_v15 }
  0x49   : > { %311 = vmatmul.f32.vlgmr.msra.gmra.mxu0 %v1326_v16  ;;  %383 = vmatmul.f32.vlgmr.msra.gmra.mxu3 %v1358_v24 }
  0x4a   : > { %974 = vmatpush.msrb.mxu3 %v429_v27  ;;  %441 = vmatpush.msra.mxu1 %v418_v48 }
  0x4c   : > { %975 = vmatpush.msrb.mxu3 %v428_v28  ;;  %442 = vmatpush.msra.mxu1 %v417_v50 }
  0x4e   : > { %976 = vmatpush.msrb.mxu3 %v427_v30  ;;  %443 = vmatpush.msra.mxu1 %v416_v53 }
  0x50   : > { %977 = vmatpush.msrb.mxu3 %v426_v32  ;;  %444 = vmatpush.msra.mxu1 %v415_v54 }
  0x51   : > { %314 = vmatmul.f32.gmra.mxu0 %v1330_v17  ;;  %386 = vmatmul.f32.gmra.mxu3 %v1366_v26 }
  0x52   : > { %978 = vmatpush.msrb.mxu3 %v425_v33  ;;  %445 = vmatpush.msra.mxu1 %v414_v56 }
  0x53   : > { %446 = vmatmul.f32.vlgmr.msra.gmra.mxu1 %v1326_v16 }
  0x54   : > { %979 = vmatpush.msrb.mxu3 %v424_v34 }
  0x56   : > { %980 = vmatpush.msrb.mxu3 %v423_v36 }
  0x58   : > { %981 = vmatpush.msrb.mxu3 %v422_v38 }
  0x59   : > { %317 = vmatmul.f32.gmra.mxu0 %v1334_v18  ;;  %389 = vmatmul.f32.gmra.mxu3 %v1383_v31 }
  0x5a   : > { %982 = vmatpush.msrb.mxu3 %v421_v41 }
  0x5b   : > { %449 = vmatmul.f32.gmra.mxu1 %v1330_v17 }
  0x5c   : > { %983 = vmatpush.msrb.mxu3 %v420_v43 }
  0x5e   : > { %984 = vmatpush.msrb.mxu3 %v419_v45 }
  0x60   : > { %985 = vmatpush.msrb.mxu3 %v418_v48 }
  0x61   : > { %320 = vmatmul.f32.gmra.mxu0 %v1338_v19  ;;  %392 = vmatmul.f32.gmra.mxu3 %v1403_v37 }
  0x62   : > { %986 = vmatpush.msrb.mxu3 %v417_v50 }
  0x63   : > { %452 = vmatmul.f32.gmra.mxu1 %v1334_v18 }
  0x64   : > { %987 = vmatpush.msrb.mxu3 %v416_v53 }
  0x66   : > { %988 = vmatpush.msrb.mxu3 %v415_v54 }
  0x68   : > { %989 = vmatpush.msrb.mxu3 %v414_v56 }
  0x69   : > { %323 = vmatmul.f32.gmra.mxu0 %v1342_v20  ;;  %395 = vmatmul.f32.gmra.mxu3 %v1435_v47 }
  0x6a   : > { %990 = vmatpush.msra.mxu3 %v413_v39 }
  0x6b   : > { %455 = vmatmul.f32.gmra.mxu1 %v1338_v19 }
  0x6c   : > { %991 = vmatpush.msra.mxu3 %v412_v40 }
  0x6e   : > { %992 = vmatpush.msra.mxu3 %v411_v42 }
  0x70   : > { %993 = vmatpush.msra.mxu3 %v410_v46 }
  0x71   : > { %326 = vmatmul.f32.gmra.mxu0 %v1346_v21  ;;  %398 = vmatmul.f32.gmra.mxu3 %v276_v55 }
  0x72   : > { %994 = vmatpush.msra.mxu3 %v409_v49 }
  0x73   : > { %458 = vmatmul.f32.gmra.mxu1 %v1342_v20 }
  0x74   : > { %995 = vmatpush.msra.mxu3 %v408_v51 }
  0x79   : > { %329 = vmatmul.f32.gmra.mxu0 %v1350_v22  ;;  %401 = vmatmul.f32.gmra.mxu3 %v277_v58 }
  0x7b   : > { %461 = vmatmul.f32.gmra.mxu1 %v1346_v21 }
  0x81   : > { %332 = vmatmul.f32.gmra.mxu0 %v1354_v23  ;;  %404 = vmatmul.f32.gmra.mxu3 %v278_v60 }
  0x83   : > { %464 = vmatmul.f32.gmra.mxu1 %v1350_v22 }
  0x89   : > { %335 = vmatmul.f32.gmra.mxu0 %v1362_v25  ;;  %518 = vmatmul.f32.vlgmr.msrb.gmra.mxu3 %v1358_v24 }
  0x8b   : > { %467 = vmatmul.f32.gmra.mxu1 %v1354_v23 }
  0x91   : > { %338 = vmatmul.f32.gmra.mxu0 %v1376_v29  ;;  %521 = vmatmul.f32.gmra.mxu3 %v1366_v26 }
  0x93   : > { %470 = vmatmul.f32.gmra.mxu1 %v1362_v25 }
  0x99   : > { %341 = vmatmul.f32.gmra.mxu0 %v1396_v35  ;;  %524 = vmatmul.f32.gmra.mxu3 %v1383_v31 }
  0x9b   : > { %473 = vmatmul.f32.gmra.mxu1 %v1376_v29 }
  0xa1   : > { %344 = vmatmul.f32.gmra.mxu0 %v1425_v44  ;;  %527 = vmatmul.f32.gmra.mxu3 %v1403_v37 }
  0xa3   : > { %476 = vmatmul.f32.gmra.mxu1 %v1396_v35  ;;  %v1565_v35 = vld [vmem:[%s1694_s4] ss:$0 sm:$0xff] }
  0xa9   : > { %347 = vmatmul.f32.gmra.mxu0 %v1451_v52  ;;  %530 = vmatmul.f32.gmra.mxu3 %v1435_v47 }
  0xab   : > { %479 = vmatmul.f32.gmra.mxu1 %v1425_v44 }
  0xb1   : > { %350 = vmatmul.f32.gmra.mxu0 %v1466_v57  ;;  %533 = vmatmul.f32.gmra.mxu3 %v276_v55 }
  0xb3   : > { %482 = vmatmul.f32.gmra.mxu1 %v1451_v52 }
  0xb9   : > { %353 = vmatmul.f32.gmra.mxu0 %v1472_v59  ;;  %536 = vmatmul.f32.gmra.mxu3 %v277_v58 }
  0xbb   : > { %485 = vmatmul.f32.gmra.mxu1 %v1466_v57 }
  0xc1   : > { %356 = vmatmul.f32.gmra.mxu0 %v1478_v61  ;;  %539 = vmatmul.f32.gmra.mxu3 %v278_v60 }
  0xc3   : > { %488 = vmatmul.f32.gmra.mxu1 %v1472_v59 }
  0xc6   : > { %v312_v62 = vpop.f32.mrf.mxu0 }
  0xc7   : > { %919 = vmatmul.msk.f32.vlgmr.msra.gmra.mxu2 %vm543_vm0, %v312_v62 }
  0xc9   : > { %359 = vmatmul.f32.gmra.mxu0 %v1484_v63 }
  0xcb   : > { %491 = vmatmul.f32.gmra.mxu1 %v1478_v61 }
  0xcc   : > { %v1535_v15 = vpop.f32.mrf.mxu3 }
  0xce   : > { %v315_v0 = vpop.f32.mrf.mxu0 }
  0xcf   : > { %920 = vmatmul.msk.f32.gmra.mxu2 %vm543_vm0, %v315_v0 }
  0xd0   : > { %v447_v24 = vpop.f32.mrf.mxu1 }
  0xd1   : > { %362 = vmatmul.f32.gmra.mxu0 %v1491_v1 }
  0xd3   : > { %494 = vmatmul.f32.gmra.mxu1 %v1484_v63 }
  0xd4   : > { %v1539_v17 = vpop.f32.mrf.mxu3 }
  0xd6   : > { %v318_v2 = vpop.f32.mrf.mxu0 }
  0xd7   : > { %921 = vmatmul.msk.f32.gmra.mxu2 %vm543_vm0, %v318_v2 }
  0xd8   : > { %v450_v27 = vpop.f32.mrf.mxu1 }
  0xd9   : > { %365 = vmatmul.f32.gmra.mxu0 %v1498_v3 }
  0xdb   : > { %497 = vmatmul.f32.gmra.mxu1 %v1491_v1 }
  0xdc   : > { %v390_v19 = vpop.f32.mrf.mxu3 }
  0xdd   : > { %945 = vmatmul.msk.f32.vlgmr.msra.gmra.mxu3 %vm543_vm0, %v390_v19 }
  0xde   : > { %v321_v4 = vpop.f32.mrf.mxu0 }
  0xdf   : > { %922 = vmatmul.msk.f32.gmra.mxu2 %vm543_vm0, %v321_v4 }
  0xe0   : > { %v453_v30 = vpop.f32.mrf.mxu1 }
  0xe1   : > { %368 = vmatmul.f32.gmra.mxu0 %v1505_v5 }
  0xe3   : > { %500 = vmatmul.f32.gmra.mxu1 %v1498_v3 }
  0xe4   : > { %v393_v21 = vpop.f32.mrf.mxu3 }
  0xe5   : > { %946 = vmatmul.msk.f32.gmra.mxu3 %vm543_vm0, %v393_v21 }
  0xe6   : > { %v324_v6 = vpop.f32.mrf.mxu0 }
  0xe7   : > { %923 = vmatmul.msk.f32.gmra.mxu2 %vm543_vm0, %v324_v6 }
  0xe8   : > { %v456_v33 = vpop.f32.mrf.mxu1 }
  0xe9   : > { %371 = vmatmul.f32.gmra.mxu0 %v1512_v7 }
  0xeb   : > { %503 = vmatmul.f32.gmra.mxu1 %v1505_v5 }
  0xec   : > { %v396_v23 = vpop.f32.mrf.mxu3 }
  0xed   : > { %947 = vmatmul.msk.f32.gmra.mxu3 %vm543_vm0, %v396_v23 }
  0xee   : > { %v327_v8 = vpop.f32.mrf.mxu0 }
  0xef   : > { %924 = vmatmul.msk.f32.gmra.mxu2 %vm543_vm0, %v327_v8 }
  0xf0   : > { %v459_v37 = vpop.f32.mrf.mxu1 }
  0xf1   : > { %374 = vmatmul.f32.gmra.mxu0 %v1518_v9 }
  0xf3   : > { %506 = vmatmul.f32.gmra.mxu1 %v1512_v7 }
  0xf4   : > { %v399_v26 = vpop.f32.mrf.mxu3 }
  0xf5   : > { %948 = vmatmul.msk.f32.gmra.mxu3 %vm543_vm0, %v399_v26 }
  0xf6   : > { %v330_v10 = vpop.f32.mrf.mxu0 }
  0xf7   : > { %925 = vmatmul.msk.f32.gmra.mxu2 %vm543_vm0, %v330_v10 }
  0xf8   : > { %v462_v42 = vpop.f32.mrf.mxu1 }
  0xf9   : > { %377 = vmatmul.f32.gmra.mxu0 %v1524_v11 }
  0xfb   : > { %509 = vmatmul.f32.gmra.mxu1 %v1518_v9 }
  0xfc   : > { %v402_v29 = vpop.f32.mrf.mxu3 }
  0xfd   : > { %949 = vmatmul.msk.f32.gmra.mxu3 %vm543_vm0, %v402_v29 }
  0xfe   : > { %v333_v12 = vpop.f32.mrf.mxu0 }
  0xff   : > { %926 = vmatmul.msk.f32.gmra.mxu2 %vm543_vm0, %v333_v12 }
 0x100   : > { %v465_v48 = vpop.f32.mrf.mxu1 }
 0x101   : > { %380 = vmatmul.f32.gmra.mxu0 %v1530_v13 }
 0x103   : > { %512 = vmatmul.f32.gmra.mxu1 %v1524_v11 }
 0x104   : > { %v405_v32 = vpop.f32.mrf.mxu3 }
 0x105   : > { %950 = vmatmul.msk.f32.gmra.mxu3 %vm543_vm0, %v405_v32 }
 0x106   : > { %v336_v14 = vpop.f32.mrf.mxu0 }
 0x107   : > { %927 = vmatmul.msk.f32.gmra.mxu2 %vm543_vm0, %v336_v14 }
 0x108   : > { %v468_v54 = vpop.f32.mrf.mxu1 }
 0x10b   : > { %515 = vmatmul.f32.gmra.mxu1 %v1530_v13 }
 0x10c   : > { %v1579_v46 = vpop.f32.mrf.mxu3 }
 0x10e   : > { %v339_v16 = vpop.f32.mrf.mxu0 }
 0x10f   : > { %928 = vmatmul.msk.f32.gmra.mxu2 %vm543_vm0, %v339_v16 }
 0x110   : > { %v471_v60 = vpop.f32.mrf.mxu1 }
 0x114   : > { %v1585_v52 = vpop.f32.mrf.mxu3 }
 0x116   : > { %v342_v18 = vpop.f32.mrf.mxu0 }
 0x117   : > { %929 = vmatmul.msk.f32.gmra.mxu2 %vm543_vm0, %v342_v18 }
 0x118   : > { %v474_v3 = vpop.f32.mrf.mxu1 }
 0x11c   : > { %v525_v58 = vpop.f32.mrf.mxu3 }
 0x11e   : > { %v345_v20 = vpop.f32.mrf.mxu0 }
 0x11f   : > { %930 = vmatmul.msk.f32.gmra.mxu2 %vm543_vm0, %v345_v20 }
 0x120   : > { %v477_v11 = vpop.f32.mrf.mxu1 }
 0x124   : > { %v528_v0 = vpop.f32.mrf.mxu3 }
 0x126   : > { %v348_v22 = vpop.f32.mrf.mxu0 }
 0x127   : > { %931 = vmatmul.msk.f32.gmra.mxu2 %vm543_vm0, %v348_v22 }
 0x128   : > { %v480_v19 = vpop.f32.mrf.mxu1 }
 0x12c   : > { %v531_v6 = vpop.f32.mrf.mxu3 }
 0x12e   : > { %v351_v25 = vpop.f32.mrf.mxu0 }
 0x12f   : > { %932 = vmatmul.msk.f32.gmra.mxu2 %vm543_vm0, %v351_v25 }
 0x130   : > { %v483_v25 = vpop.f32.mrf.mxu1 }
 0x134   : > { %v534_v12 = vpop.f32.mrf.mxu3 }
 0x136   : > { %v354_v28 = vpop.f32.mrf.mxu0 }
 0x137   : > { %933 = vmatmul.msk.f32.gmra.mxu2 %vm543_vm0, %v354_v28 }
 0x13c   : > { %v537_v18 = vpop.f32.mrf.mxu3 }
 0x13e   : > { %v357_v31 = vpop.f32.mrf.mxu0 }
 0x13f   : > { %934 = vmatmul.msk.f32.gmra.mxu2 %vm543_vm0, %v357_v31 }
 0x144   : > { %v540_v23 = vpop.f32.mrf.mxu3 }
 0x146   : > { %v360_v34 = vpop.f32.mrf.mxu0 }
 0x147   : > { %935 = vmatmul.msk.f32.gmra.mxu2 %vm543_vm0, %v360_v34 }
 0x14a   : > { %v657_v36 = vpop.f32.mrf.mxu2 }
 0x14b   : > { %v658_v38 = vadd.f32 %v657_v36, %v447_v24 }
 0x14d   : > { %v757_v39 = vadd.f32 %v1565_v35, %v658_v38 }
 0x14e   : > { %v363_v40 = vpop.f32.mrf.mxu0 }
 0x14f   : > { %789 = vst [vmem:[%s1571_s23] sm:$0xff] %v757_v39  ;;  %936 = vmatmul.msk.f32.gmra.mxu2 %vm543_vm0, %v363_v40 }
 0x152   : > { %v660_v41 = vpop.f32.mrf.mxu2 }
 0x153   : > { %v661_v43 = vadd.f32 %v660_v41, %v450_v27 }
 0x155   : > { %v758_v44 = vadd.f32 %v1565_v35, %v661_v43 }
 0x156   : > { %v366_v45 = vpop.f32.mrf.mxu0 }
 0x157   : > { %790 = vst [vmem:[%s1571_s23 + $0x8] sm:$0xff] %v758_v44  ;;  %937 = vmatmul.msk.f32.gmra.mxu2 %vm543_vm0, %v366_v45 }
 0x15a   : > { %v663_v47 = vpop.f32.mrf.mxu2 }
 0x15b   : > { %v664_v49 = vadd.f32 %v663_v47, %v453_v30  ;;  %v486_v30 = vpop.f32.mrf.mxu1 }
 0x15d   : > { %v759_v50 = vadd.f32 %v1565_v35, %v664_v49 }
 0x15e   : > { %v369_v51 = vpop.f32.mrf.mxu0 }
 0x15f   : > { %791 = vst [vmem:[%s1571_s23 + $0x10] sm:$0xff] %v759_v50  ;;  %938 = vmatmul.msk.f32.gmra.mxu2 %vm543_vm0, %v369_v51 }
 0x160   : > { %v735_v29 = vpop.f32.mrf.mxu3 }
 0x161   : > { %v736_v31 = vadd.f32 %v735_v29, %v525_v58 }
 0x162   : > { %v666_v53 = vpop.f32.mrf.mxu2 }
 0x163   : > { %v667_v55 = vadd.f32 %v666_v53, %v456_v33  ;;  %v783_v33 = vadd.f32 %v1565_v35, %v736_v31  ;;  %v489_v39 = vpop.f32.mrf.mxu1 }
 0x165   : > { %v760_v56 = vadd.f32 %v1565_v35, %v667_v55  ;;  %815 = vst [vmem:[%s1571_s23 + $0xd0] sm:$0xff] %v783_v33 }
 0x166   : > { %v372_v57 = vpop.f32.mrf.mxu0 }
 0x167   : > { %792 = vst [vmem:[%s1571_s23 + $0x18] sm:$0xff] %v760_v56  ;;  %939 = vmatmul.msk.f32.gmra.mxu2 %vm543_vm0, %v372_v57 }
 0x168   : > { %v738_v36 = vpop.f32.mrf.mxu3 }
 0x16a   : > { %v669_v59 = vpop.f32.mrf.mxu2 }
 0x16b   : > { %v670_v61 = vadd.f32 %v669_v59, %v459_v37  ;;  %v739_v37 = vadd.f32 %v738_v36, %v528_v0 }
 0x16d   : > { %v761_v62 = vadd.f32 %v1565_v35, %v670_v61  ;;  %v784_v40 = vadd.f32 %v1565_v35, %v739_v37 }
 0x16e   : > { %v375_v63 = vpop.f32.mrf.mxu0 }
 0x16f   : > { %793 = vst [vmem:[%s1571_s23 + $0x20] sm:$0xff] %v761_v62  ;;  %940 = vmatmul.msk.f32.gmra.mxu2 %vm543_vm0, %v375_v63 }
 0x170   : > { %816 = vst [vmem:[%s1571_s23 + $0xd8] sm:$0xff] %v784_v40  ;;  %v741_v43 = vpop.f32.mrf.mxu3 }
 0x171   : > { %v742_v44 = vadd.f32 %v741_v43, %v531_v6 }
 0x172   : > { %v672_v1 = vpop.f32.mrf.mxu2 }
 0x173   : > { %v673_v2 = vadd.f32 %v672_v1, %v462_v42  ;;  %v785_v47 = vadd.f32 %v1565_v35, %v742_v44 }
 0x175   : > { %v762_v4 = vadd.f32 %v1565_v35, %v673_v2  ;;  %817 = vst [vmem:[%s1571_s23 + $0xe0] sm:$0xff] %v785_v47 }
 0x176   : > { %v378_v5 = vpop.f32.mrf.mxu0 }
 0x177   : > { %794 = vst [vmem:[%s1571_s23 + $0x28] sm:$0xff] %v762_v4  ;;  %941 = vmatmul.msk.f32.gmra.mxu2 %vm543_vm0, %v378_v5 }
 0x178   : > { %v744_v51 = vpop.f32.mrf.mxu3 }
 0x179   : > { %v745_v53 = vadd.f32 %v744_v51, %v534_v12 }
 0x17a   : > { %v675_v7 = vpop.f32.mrf.mxu2 }
 0x17b   : > { %v676_v8 = vadd.f32 %v675_v7, %v465_v48  ;;  %v492_v48 = vpop.f32.mrf.mxu1  ;;  %v786_v55 = vadd.f32 %v1565_v35, %v745_v53 }
 0x17d   : > { %v763_v9 = vadd.f32 %v1565_v35, %v676_v8  ;;  %818 = vst [vmem:[%s1571_s23 + $0xe8] sm:$0xff] %v786_v55 }
 0x17e   : > { %v381_v10 = vpop.f32.mrf.mxu0 }
 0x17f   : > { %795 = vst [vmem:[%s1571_s23 + $0x30] sm:$0xff] %v763_v9  ;;  %942 = vmatmul.msk.f32.gmra.mxu2 %vm543_vm0, %v381_v10 }
 0x180   : > { %v747_v59 = vpop.f32.mrf.mxu3 }
 0x182   : > { %v678_v13 = vpop.f32.mrf.mxu2 }
 0x183   : > { %v679_v14 = vadd.f32 %v678_v13, %v468_v54  ;;  %v495_v57 = vpop.f32.mrf.mxu1 }
 0x185   : > { %v764_v16 = vadd.f32 %v1565_v35, %v679_v14 }
 0x187   : > { %796 = vst [vmem:[%s1571_s23 + $0x38] sm:$0xff] %v764_v16  ;;  %943 = vmatmul.msk.f32.gmra.mxu2 %vm543_vm0, %v1535_v15 }
 0x188   : > { %v750_v1 = vpop.f32.mrf.mxu3 }
 0x18a   : > { %v681_v20 = vpop.f32.mrf.mxu2 }
 0x18b   : > { %v682_v21 = vadd.f32 %v681_v20, %v471_v60  ;;  %v748_v60 = vadd.f32 %v747_v59, %v537_v18  ;;  %v498_v2 = vpop.f32.mrf.mxu1 }
 0x18d   : > { %v765_v22 = vadd.f32 %v1565_v35, %v682_v21  ;;  %v787_v62 = vadd.f32 %v1565_v35, %v748_v60 }
 0x18f   : > { %797 = vst [vmem:[%s1571_s23 + $0x40] sm:$0xff] %v765_v22  ;;  %944 = vmatmul.msk.f32.gmra.mxu2 %vm543_vm0, %v1539_v17 }
 0x190   : > { %819 = vst [vmem:[%s1571_s23 + $0xf0] sm:$0xff] %v787_v62 }
 0x192   : > { %v684_v24 = vpop.f32.mrf.mxu2 }
 0x193   : > { %v685_v26 = vadd.f32 %v684_v24, %v474_v3  ;;  %v751_v3 = vadd.f32 %v750_v1, %v540_v23  ;;  %v501_v9 = vpop.f32.mrf.mxu1 }
 0x195   : > { %v766_v27 = vadd.f32 %v1565_v35, %v685_v26  ;;  %v788_v5 = vadd.f32 %v1565_v35, %v751_v3 }
 0x197   : > { %798 = vst [vmem:[%s1571_s23 + $0x48] sm:$0xff] %v766_v27 }
 0x198   : > { %820 = vst [vmem:[%s1571_s23 + $0xf8] sm:$0xff] %v788_v5 }
 0x19a   : > { %v687_v15 = vpop.f32.mrf.mxu2 }
 0x19b   : > { %v688_v28 = vadd.f32 %v687_v15, %v477_v11  ;;  %v504_v13 = vpop.f32.mrf.mxu1 }
 0x19d   : > { %v767_v32 = vadd.f32 %v1565_v35, %v688_v28 }
 0x19f   : > { %799 = vst [vmem:[%s1571_s23 + $0x50] sm:$0xff] %v767_v32 }
 0x1a2   : > { %v690_v17 = vpop.f32.mrf.mxu2 }
 0x1a3   : > { %v691_v34 = vadd.f32 %v690_v17, %v480_v19  ;;  %v507_v20 = vpop.f32.mrf.mxu1 }
 0x1a5   : > { %v768_v38 = vadd.f32 %v1565_v35, %v691_v34 }
 0x1a7   : > { %800 = vst [vmem:[%s1571_s23 + $0x58] sm:$0xff] %v768_v38 }
 0x1aa   : > { %v693_v41 = vpop.f32.mrf.mxu2 }
 0x1ab   : > { %v694_v42 = vadd.f32 %v693_v41, %v483_v25  ;;  %v510_v25 = vpop.f32.mrf.mxu1 }
 0x1ad   : > { %v769_v45 = vadd.f32 %v1565_v35, %v694_v42 }
 0x1af   : > { %801 = vst [vmem:[%s1571_s23 + $0x60] sm:$0xff] %v769_v45 }
 0x1b2   : > { %v696_v49 = vpop.f32.mrf.mxu2 }
 0x1b3   : > { %v697_v50 = vadd.f32 %v696_v49, %v486_v30  ;;  %v513_v29 = vpop.f32.mrf.mxu1 }
 0x1b5   : > { %v770_v54 = vadd.f32 %v1565_v35, %v697_v50 }
 0x1b7   : > { %802 = vst [vmem:[%s1571_s23 + $0x68] sm:$0xff] %v770_v54 }
 0x1ba   : > { %v699_v56 = vpop.f32.mrf.mxu2 }
 0x1bb   : > { %v700_v58 = vadd.f32 %v699_v56, %v489_v39  ;;  %v516_v33 = vpop.f32.mrf.mxu1 }
 0x1bd   : > { %v771_v61 = vadd.f32 %v1565_v35, %v700_v58 }
 0x1bf   : > { %803 = vst [vmem:[%s1571_s23 + $0x70] sm:$0xff] %v771_v61 }
 0x1c2   : > { %v702_v63 = vpop.f32.mrf.mxu2 }
 0x1c3   : > { %v703_v0 = vadd.f32 %v702_v63, %v492_v48 }
 0x1c5   : > { %v772_v4 = vadd.f32 %v1565_v35, %v703_v0 }
 0x1c7   : > { %804 = vst [vmem:[%s1571_s23 + $0x78] sm:$0xff] %v772_v4 }
 0x1ca   : > { %v705_v6 = vpop.f32.mrf.mxu2 }
 0x1cb   : > { %v706_v7 = vadd.f32 %v705_v6, %v495_v57 }
 0x1cd   : > { %v773_v8 = vadd.f32 %v1565_v35, %v706_v7 }
 0x1cf   : > { %805 = vst [vmem:[%s1571_s23 + $0x80] sm:$0xff] %v773_v8 }
 0x1d2   : > { %v708_v10 = vpop.f32.mrf.mxu2 }
 0x1d3   : > { %v709_v11 = vadd.f32 %v708_v10, %v498_v2 }
 0x1d5   : > { %v774_v12 = vadd.f32 %v1565_v35, %v709_v11 }
 0x1d7   : > { %806 = vst [vmem:[%s1571_s23 + $0x88] sm:$0xff] %v774_v12 }
 0x1da   : > { %v711_v14 = vpop.f32.mrf.mxu2 }
 0x1db   : > { %v712_v16 = vadd.f32 %v711_v14, %v501_v9 }
 0x1dd   : > { %v775_v18 = vadd.f32 %v1565_v35, %v712_v16 }
 0x1df   : > { %807 = vst [vmem:[%s1571_s23 + $0x90] sm:$0xff] %v775_v18 }
 0x1e2   : > { %v714_v19 = vpop.f32.mrf.mxu2 }
 0x1e3   : > { %v715_v21 = vadd.f32 %v714_v19, %v504_v13 }
 0x1e5   : > { %v776_v22 = vadd.f32 %v1565_v35, %v715_v21 }
 0x1e7   : > { %808 = vst [vmem:[%s1571_s23 + $0x98] sm:$0xff] %v776_v22 }
 0x1ea   : > { %v717_v23 = vpop.f32.mrf.mxu2 }
 0x1eb   : > { %v718_v24 = vadd.f32 %v717_v23, %v507_v20 }
 0x1ed   : > { %v777_v26 = vadd.f32 %v1565_v35, %v718_v24 }
 0x1ef   : > { %809 = vst [vmem:[%s1571_s23 + $0xa0] sm:$0xff] %v777_v26 }
 0x1f2   : > { %v720_v27 = vpop.f32.mrf.mxu2 }
 0x1f3   : > { %v721_v15 = vadd.f32 %v720_v27, %v510_v25 }
 0x1f5   : > { %v778_v28 = vadd.f32 %v1565_v35, %v721_v15 }
 0x1f7   : > { %810 = vst [vmem:[%s1571_s23 + $0xa8] sm:$0xff] %v778_v28 }
 0x1fa   : > { %v723_v30 = vpop.f32.mrf.mxu2 }
 0x1fb   : > { %v724_v31 = vadd.f32 %v723_v30, %v513_v29 }
 0x1fd   : > { %v779_v32 = vadd.f32 %v1565_v35, %v724_v31 }
 0x1ff   : > { %811 = vst [vmem:[%s1571_s23 + $0xb0] sm:$0xff] %v779_v32 }
 0x202   : > { %v726_v17 = vpop.f32.mrf.mxu2 }
 0x203   : > { %v727_v34 = vadd.f32 %v726_v17, %v516_v33 }
 0x205   : > { %v780_v36 = vadd.f32 %v1565_v35, %v727_v34 }
 0x207   : > { %812 = vst [vmem:[%s1571_s23 + $0xb8] sm:$0xff] %v780_v36 }
 0x20a   : > { %v729_v37 = vpop.f32.mrf.mxu2 }
 0x20b   : > { %v730_v38 = vadd.f32 %v729_v37, %v1579_v46 }
 0x20d   : > { %v781_v39 = vadd.f32 %v1565_v35, %v730_v38 }
 0x20f   : > { %813 = vst [vmem:[%s1571_s23 + $0xc0] sm:$0xff] %v781_v39 }
 0x212   : > { %v732_v40 = vpop.f32.mrf.mxu2 }
 0x213   : > { %v733_v41 = vadd.f32 %v732_v40, %v1585_v52 }
 0x215   : > { %v782_v42 = vadd.f32 %v1565_v35, %v733_v41 }
 0x217   : > { %814 = vst [vmem:[%s1571_s23 + $0xc8] sm:$0xff] %v782_v42 }
 0x218   : > { %1104 = shalt.err (!%p1101_p4)
}
 0x219   : > { %s1147_s12 = smov 128   ;;  %s1148_s11 = smov 8  }
 0x21a   : > { %998 = dma.vmem_to_hbm [thread:$0]  (%p1229_p11), %s835_s17, 4096, %s837_s26, %s822_s8, %s1147_s12, %s1147_s12, %s1148_s11  }
 0x21b PF: > { %s851_s23 = sand.u32 1, %s1131_s18   ;;  %p1701_p7 = scmp.ge.s32.totalorder %s1143_s21, 2 }
 0x21c   : > { %s852_s14 = scalar_lea.sflag [#allocation4], %s851_s23 }
 0x21d   : > { %p1005_p5 = pnand %p1701_p7, %p1233_p12 }
 0x21f   : > { %p1006_p8 = pneg %p1005_p5 }
 0x221   : > { %1126 = dma.done.wait (%p1006_p8), %s852_s14, 4096  }
 0x222   : > { %1128 = vsyncadd (%p1006_p8), %s852_s14, 4294963200  ;;  %p18_p10 = scmp.ge.s32.totalorder %s1204_s24, 4   ;;  %s1702_s18 = smov %s1135_s19 }
 0x223   : > { %s1703_s19 = smov %s1139_s20  ;;  %s1704_s20 = smov %s1216_s27 }
 0x224   : > { %s1705_s21 = smov %s1204_s24  ;;  %20 = sbr.rel (!%p18_p10) target bundleno = 5 (0x5), region = 85 }
 0x229   :  { %858 = vsyncpa [#allocation3], 1 }
 0x22a   :  { %860 = vsyncpa [#allocation3 + $0x1], 1 }
 0x22b   :  { %861 = vsyncpa [#allocation4], 1 }
 0x22c   :  { %863 = vsyncpa [#allocation4 + $0x1], 1 }

</bundles_post_ra>
